<compile_context>
chip_gen: v6e
topology: v6e:2x2x1
jax: 0.10.0
libtpu: 0.0.40
codegen_flags: <defaults>
</compile_context>

<pallas_src>
import functools

import jax
import jax.numpy as jnp
import numpy as np
from jax.experimental import pallas as pl
from jax.experimental.pallas import tpu as pltpu


# ---------------------------------------------------------------------------
# Pallas kernel
# ---------------------------------------------------------------------------
def _conv1d_bn_relu_kernel(x_ref, w_ref, b_ref, o_ref, *, L, K, pad):
    """Fused Conv1d(k=K, s=1, p=pad) + folded-BN bias + ReLU, one batch elem.

    x_ref: (1, Cin, L)    -- L on lanes, Cin on sublanes
    w_ref: (Cout, K*Cin)  -- BN scale already folded in; columns tap-major
    b_ref: (Cout, 1)      -- folded BN bias
    o_ref: (1, Cout, L)   -- lane-dense output (L on lanes)
    """
    Cin = x_ref.shape[1]
    x = x_ref[0]                                          # (Cin, L)
    zeros = jnp.zeros((Cin, pad), x.dtype)
    xp = jnp.concatenate([zeros, x, zeros], axis=1)       # (Cin, L + 2*pad), in vregs
    # im2col: stack the K shifted views along the contraction axis and do a
    # single MXU dot with K*Cin contraction depth (not K tiny dots).
    patch = jnp.concatenate([xp[:, k:k + L] for k in range(K)], axis=0)  # (K*Cin, L)
    y = jnp.dot(w_ref[...], patch, preferred_element_type=jnp.float32)   # (Cout, L)
    y = y + b_ref[...]                                    # bias broadcast over lanes
    o_ref[...] = jnp.maximum(y, 0.0)[None].astype(o_ref.dtype)


# ---------------------------------------------------------------------------
# Wrapper
# ---------------------------------------------------------------------------
def conv_bn_relu_1d(x, weight, gamma, beta, running_mean, running_var,
                    *, pad=1, eps=1e-5):
    """x: (B, Cin, L) f32.  weight: PyTorch Conv1d layout (Cout, Cin, K)."""
    B, Cin, L = x.shape
    Cout, Cin_w, K = weight.shape
    assert Cin_w == Cin
    assert 2 * pad == K - 1, "only 'same'-size conv (stride=1, dilation=1)"

    # Fold inference-mode BatchNorm into the conv: scale into the weights
    # (one-time trace-time cost), keep only the bias for the in-kernel epilogue.
    scale = gamma / jnp.sqrt(running_var + eps)                      # (Cout,)
    bias = (beta - running_mean * scale).reshape(Cout, 1)            # (Cout, 1)
    # (Cout, Cin, K) -> (Cout, K, Cin) -> (Cout, K*Cin): columns tap-major to
    # match the in-kernel im2col row order (row r = k*Cin + ci).
    w2 = jnp.transpose(weight, (0, 2, 1)).reshape(Cout, K * Cin) * scale[:, None]

    kern = functools.partial(_conv1d_bn_relu_kernel, L=L, K=K, pad=pad)
    return pl.pallas_call(
        kern,
        out_shape=jax.ShapeDtypeStruct((B, Cout, L), jnp.float32),
        grid=(B,),
        in_specs=[
            pl.BlockSpec((1, Cin, L), lambda b: (b, 0, 0)),
            pl.BlockSpec((Cout, K * Cin), lambda b: (0, 0)),
            pl.BlockSpec((Cout, 1), lambda b: (0, 0)),
        ],
        out_specs=pl.BlockSpec((1, Cout, L), lambda b: (b, 0, 0)),
        compiler_params=pltpu.CompilerParams(
            dimension_semantics=("parallel",)),
    )(x.astype(jnp.float32), w2.astype(jnp.float32), bias.astype(jnp.float32))


# ---------------------------------------------------------------------------
# Pure-JAX reference (for correctness check)
# ---------------------------------------------------------------------------
def _reference(x, weight, gamma, beta, mean, var, eps=1e-5):
    y = jax.lax.conv_general_dilated(
        x, weight, window_strides=(1,), padding=[(1, 1)],
        dimension_numbers=("NCH", "OIH", "NCH"))
    scale = gamma / jnp.sqrt(var + eps)
    bias = beta - mean * scale
    y = y * scale[None, :, None] + bias[None, :, None]
    return jnp.maximum(y, 0.0)


# ---------------------------------------------------------------------------
if __name__ == "__main__":
    key = jax.random.PRNGKey(0)
    kx, kw, kg, kb, km, kv = jax.random.split(key, 6)

    B, Cin, Cout, L = 2, 8, 32, 128        # small, lane-aligned example shapes
    x = jax.random.normal(kx, (B, Cin, L), jnp.float32)
    weight = jax.random.normal(kw, (Cout, Cin, 3), jnp.float32) * 0.1
    gamma = jax.random.uniform(kg, (Cout,), minval=0.8, maxval=1.2)
    beta = jax.random.normal(kb, (Cout,)) * 0.1
    running_mean = jax.random.normal(km, (Cout,)) * 0.1
    running_var = jax.random.uniform(kv, (Cout,), minval=0.5, maxval=1.5)

    out = conv_bn_relu_1d(x, weight, gamma, beta, running_mean, running_var)
    jax.block_until_ready(out)
    assert out.shape == (B, Cout, L) and out.dtype == jnp.float32

    ref = _reference(x, weight, gamma, beta, running_mean, running_var)
    np.testing.assert_allclose(np.asarray(out), np.asarray(ref),
                               rtol=2e-2, atol=2e-2)
    print("KERNEL_OK")
</pallas_src>

<mosaic_0001>
module attributes {stable_mosaic.version = 11 : i64} {
  func.func @_conv1d_bn_relu_kernel(%arg0: i32, %arg1: memref<1x8x128xf32, #tpu.memory_space<vmem>>, %arg2: memref<32x24xf32, #tpu.memory_space<vmem>>, %arg3: memref<32x1xf32, #tpu.memory_space<vmem>>, %arg4: memref<1x32x128xf32, #tpu.memory_space<vmem>>) attributes {dimension_semantics = [#tpu.dimension_semantics<parallel>], iteration_bounds = array<i64: 2>, scalar_prefetch = 0 : i64, scratch_operands = 0 : i64, tpu.core_type = #tpu.core_type<tc>, window_params = [{transform_indices = @transform_0, window_bounds = array<i64: 1, 8, 128>}, {pipeline_mode = #tpu.pipeline_mode<synchronous>, transform_indices = @transform_1, window_bounds = array<i64: 32, 24>}, {pipeline_mode = #tpu.pipeline_mode<synchronous>, transform_indices = @transform_2, window_bounds = array<i64: 32, 1>}, {transform_indices = @transform_3, window_bounds = array<i64: 1, 32, 128>}]} {
    %c0 = arith.constant 0 : index
    %c0_0 = arith.constant 0 : index
    %c0_1 = arith.constant 0 : index
    %0 = vector.load %arg1[%c0, %c0_0, %c0_1] : memref<1x8x128xf32, #tpu.memory_space<vmem>>, vector<1x8x128xf32>
    %1 = vector.shape_cast %0 : vector<1x8x128xf32> to vector<8x128xf32>
    %cst = arith.constant 0.000000e+00 : f32
    %2 = vector.broadcast %cst : f32 to vector<8x1xf32>
    %3 = tpu.concatenate %2, %1, %2 in 1 : vector<8x1xf32>, vector<8x128xf32>, vector<8x1xf32> -> vector<8x130xf32>
    %4 = vector.extract_strided_slice %3 {offsets = [0, 0], sizes = [8, 128], strides = [1, 1]} : vector<8x130xf32> to vector<8x128xf32>
    %5 = vector.extract_strided_slice %3 {offsets = [0, 1], sizes = [8, 128], strides = [1, 1]} : vector<8x130xf32> to vector<8x128xf32>
    %6 = vector.extract_strided_slice %3 {offsets = [0, 2], sizes = [8, 128], strides = [1, 1]} : vector<8x130xf32> to vector<8x128xf32>
    %7 = tpu.concatenate %4, %5, %6 in 0 : vector<8x128xf32>, vector<8x128xf32>, vector<8x128xf32> -> vector<24x128xf32>
    %c0_2 = arith.constant 0 : index
    %c0_3 = arith.constant 0 : index
    %8 = vector.load %arg2[%c0_2, %c0_3] : memref<32x24xf32, #tpu.memory_space<vmem>>, vector<32x24xf32>
    %cst_4 = arith.constant dense<0.000000e+00> : vector<32x128xf32>
    %9 = tpu.matmul %8, %7, %cst_4 {dimension_numbers = #tpu.dot_dimension_numbers<[1], [0], [0], [1], [0, 0, 1, 1], [], []>} : vector<32x24xf32>, vector<24x128xf32>, vector<32x128xf32> -> vector<32x128xf32>
    %c0_5 = arith.constant 0 : index
    %c0_6 = arith.constant 0 : index
    %10 = vector.load %arg3[%c0_5, %c0_6] : memref<32x1xf32, #tpu.memory_space<vmem>>, vector<32x1xf32>
    %11 = vector.broadcast %10 : vector<32x1xf32> to vector<32x128xf32>
    %12 = arith.addf %9, %11 : vector<32x128xf32>
    %cst_7 = arith.constant 0.000000e+00 : f32
    %13 = vector.broadcast %cst_7 : f32 to vector<32x128xf32>
    %14 = arith.maximumf %12, %13 : vector<32x128xf32>
    %15 = vector.shape_cast %14 : vector<32x128xf32> to vector<1x32x128xf32>
    %c0_8 = arith.constant 0 : index
    %c0_9 = arith.constant 0 : index
    %c0_10 = arith.constant 0 : index
    %16 = vector.load %arg4[%c0_8, %c0_9, %c0_10] : memref<1x32x128xf32, #tpu.memory_space<vmem>>, vector<1x32x128xf32>
    tpu.vector_store %arg4[%c0_8, %c0_9, %c0_10], %15 {strides = array<i32>} : memref<1x32x128xf32, #tpu.memory_space<vmem>>, vector<1x32x128xf32>,
    return
  }
  func.func @transform_0(%arg0: i32) -> (i32, i32, i32) {
    %c0_i32 = arith.constant 0 : i32
    %c0_i32_0 = arith.constant 0 : i32
    %c0_i32_1 = arith.constant 0 : i32
    return %arg0, %c0_i32, %c0_i32_0 : i32, i32, i32
  }
  func.func @transform_1(%arg0: i32) -> (i32, i32) {
    %c0_i32 = arith.constant 0 : i32
    %c0_i32_0 = arith.constant 0 : i32
    %c0_i32_1 = arith.constant 0 : i32
    return %c0_i32, %c0_i32_0 : i32, i32
  }
  func.func @transform_2(%arg0: i32) -> (i32, i32) {
    %c0_i32 = arith.constant 0 : i32
    %c0_i32_0 = arith.constant 0 : i32
    %c0_i32_1 = arith.constant 0 : i32
    return %c0_i32, %c0_i32_0 : i32, i32
  }
  func.func @transform_3(%arg0: i32) -> (i32, i32, i32) {
    %c0_i32 = arith.constant 0 : i32
    %c0_i32_0 = arith.constant 0 : i32
    %c0_i32_1 = arith.constant 0 : i32
    return %arg0, %c0_i32, %c0_i32_0 : i32, i32, i32
  }
}

</mosaic_0001>

<bundles_post_ra>
// kernel: tpu_custom_call.1
= control target key start
LH: loop header
LB: loop body
LE: loop exit
PB: predicated region body
PF: predicated region fallthrough
CT: control target
= control target key end

     0   :  { %8 = vsyncpa [#allocation3], 0  ;;  %s712_s0 = inlined_call_operand.vmem [shape: f32[2,8,128], index: 0, kind: input, shape index: {}]   ;;  %s713_s1 = inlined_call_operand.vmem [shape: f32[32,24], index: 1, kind: input, shape index: {}]   ;;  %s714_s2 = inlined_call_operand.vmem [shape: f32[32,1], index: 2, kind: input, shape index: {}]   ;;  %s715_s3 = inlined_call_operand.hbm [shape: f32[2,32,128], index: 3, kind: output, shape index: {}]  }
   0x1   :  { %10 = vsyncpa [#allocation3 + $0x1], 0  ;;  %s579_s12 = smov 0   ;;  %s581_s13 = smov 0  }
   0x2   :  { %s583_s14 = smov 0   ;;  %s585_s15 = smov 0  }
   0x3 LB: > { %s600_s16 = sadd.s32 4294967295, %s550_s15   ;;  %s400_s17 = sadd.s32 4294967294, %s550_s15   ;;  %s550_s15 = sphi %s585_s15, %s721_s15   ;;  %s546_s14 = sphi %s583_s14, %s720_s14   ;;  %s542_s13 = sphi %s581_s13, %s719_s13   ;;  %s538_s12 = sphi %s579_s12, %s718_s12  }
   0x4   : > { %s604_s18 = sadd.s32 1, %s550_s15   ;;  %s91_s19 = sadd.s32 1, %s546_s14 }
   0x5   : > { %s88_s20 = ssub.s32 %s550_s15, %s604_s18  ;;  %p101_p0 = scmp.ne.s32.totalorder %s546_s14, %s542_s13 }
   0x6   : > { %p89_p1 = scmp.eq.s32.totalorder %s88_s20, 0  ;;  %p102_p2 = scmp.eq.s32.totalorder %s600_s16, 1 }
   0x7   : > { %p107_p3 = scmp.ne.s32.totalorder %s542_s13, %s538_s12  ;;  %p108_p4 = scmp.eq.s32.totalorder %s400_s17, 1 }
   0x8   : > { %s615_s21 = scalar_select %p89_p1, %s546_s14, %s91_s19  }
   0x9   : > { %p617_p5 = por %p102_p2, %p101_p0  ;;  %p621_p6 = por %p108_p4, %p107_p3 }
   0xa   : > { %p403_p7 = scmp.ge.s32.totalorder %s550_s15, 1  ;;  %p139_p8 = scmp.lt.s32.totalorder %s550_s15, 3 }
   0xc   : > { %p140_p9 = pnand %p403_p7, %p139_p8 }
   0xd   : > { %p162_p10 = scmp.lt.s32.totalorder (!%p140_p9), %s600_s16, 1  ;;  %s552_s29 = smov (!%p140_p9), 1  }
   0xe   : > { %143 = sbr.rel (%p140_p9) target bundleno = 477 (0x1dd), region = 32  ;;  %s554_s7 = smov (!%p140_p9), 126  }
   0xf   : > { %s555_s8 = smov (!%p140_p9), 127   ;;  %s159_s30 = sand.u32 (!%p140_p9), 1, %s542_s13  }
  0x10   : > { %s404_s4 = sshll.u32 (!%p140_p9), %s159_s30, 5  ;;  %s556_s17 = smov (!%p140_p9), [#allocation2]  }
  0x11   : > { %s161_s5 = scalar_lea.vmem (!%p140_p9), [#allocation2], %s404_s4  ;;  %s494_s19 = sshll.u32 (!%p140_p9), %s556_s17, 4  ;;  %s495_s19 = int_to_ptr.vmem [resolvable:$false] %s494_s19 }
  0x12   : > { %s338_s6 = sshll.u32 (!%p140_p9), %s161_s5, 4  ;;  %s496_s20 = scalar_lea.vmem (!%p140_p9), %s495_s19, 1024  ;;  %s665_s6 = int_to_ptr.vmem [resolvable:$true] %s338_s6 }
  0x13   : > { %s163_s24 = scalar_select %p162_p10, %s600_s16, 1  ;;  %v190_v1 = vld [vmem:[%s713_s1] sm:$0xff]  ;;  %vm218_vm0 = vcmask 195584   ;;  %v192_v2 = vld [vmem:[%s713_s1 + $0x10] sm:$0xff]  ;;  %vm171_vm1 = vcmask 7168   ;;  %v553_v3 = vmov 0  }
  0x14   : > { %431 = vmatprep.mubr.msk.f32.mxu0 %vm218_vm0, %v190_v1  ;;  %434 = vmatprep.mubr.msk.f32.mxu1 %vm218_vm0, %v192_v2  ;;  %v194_v7 = vld [vmem:[%s714_s2] sm:$0xff]  ;;  %v195_v8 = vld [vmem:[%s714_s2 + $0x8] sm:$0xff]  ;;  %v196_v9 = vld [vmem:[%s714_s2 + $0x10] sm:$0xff]  ;;  %vm187_vm2 = vcmask 1031168   ;;  %vm180_vm3 = vcmask 1039360   ;;  %s490_s11 = scalar_lea.vmem %s665_s6, 512  ;;  %p497_p0 = scmp.lt.s32.totalorder %s665_s6, %s495_s19 }
  0x15   : > { %s405_s25 = sshll.u32 %s163_s24, 3  ;;  %488 = vset.pattern.permute.xlu1 %v553_v3  ;;  %489 = vset.pattern.permute.xlu0 %v553_v3  ;;  %v197_v10 = vld [vmem:[%s714_s2 + $0x18] sm:$0xff]  ;;  %vm406_vm4 = vmneg %vm171_vm1  ;;  %v191_v17 = vld [vmem:[%s713_s1 + $0x8] sm:$0xff]  ;;  %p491_p11 = scmp.ne.s32.totalorder %s665_s6, %s490_s11 }
  0x16   : > { %s165_s28 = scalar_lea.vmem %s712_s0, %s405_s25  ;;  %v193_v18 = vld [vmem:[%s713_s1 + $0x18] sm:$0xff]  ;;  %p498_p1 = scmp.lt.s32.totalorder %s496_s20, %s490_s11 }
  0x17   : > { %v166_v0 = vld [vmem:[%s165_s28] sm:$0xff]  ;;  %p492_p12 = pnand %p491_p11, %p617_p5 }
  0x18   : > { %168 = vrot.lane.b32.xlu0 %v166_v0, %s552_s29  ;;  %p499_p2 = por %p498_p1, %p497_p0 }
  0x19   : > { %p493_p13 = pneg %p492_p12 }
  0x1b   : > { %p500_p3 = pnand %p499_p2, %p493_p13 }
  0x8a   : > { %v169_v4 = vpop.permute.xlu0 %168 }
  0x8b   : > { %v173_v5 = vsel %vm171_vm1, %v169_v4, 0.0  ;;  %v172_v6 = vsel %vm171_vm1, 0.0, %v169_v4 }
  0x8c   : > { %185 = vrot.lane.b32.xlu1 %v173_v5, %s554_s7  ;;  %183 = vrot.lane.b32.xlu0 %v172_v6, %s554_s7  ;;  %s417_s7 = sshll.u32 %s600_s16, 9  ;;  %s672_s16 = scalar_lea.sflag [#allocation3], %s159_s30 }
  0x8d   : > { %s670_s10 = scalar_lea.hbm %s715_s3, %s417_s7 }
  0x90   : > { %176 = vrot.lane.b32.xlu1 %v172_v6, %s555_s8  ;;  %178 = vrot.lane.b32.xlu0 %v173_v5, %s555_s8 }
  0x94   : > { %200 = vperm.xlu1 %488, %v194_v7   ;;  %205 = vperm.xlu0 %489, %v195_v8  }
  0x98   : > { %210 = vperm.xlu1 %488, %v196_v9  }
  0x9c   : > { %215 = vperm.xlu1 %488, %v197_v10  }
  0xfe   : > { %v186_v11 = vpop.permute.xlu1 %185  ;;  %v184_v12 = vpop.permute.xlu0 %183 }
  0xff   : > { %v188_v13 = vsel %vm187_vm2, %v184_v12, %v186_v11 }
 0x100   : > { %425 = vmatprep.subr.mxu0 %v188_v13  ;;  %437 = vmatprep.subr.mxu1 %v188_v13 }
 0x101   : > { %426 = vmatpush3.msra.mxu0 %v188_v13  ;;  %440 = vmatpush3.msra.mxu1 %v188_v13 }
 0x102   : > { %v177_v14 = vpop.permute.xlu1 %176  ;;  %v179_v15 = vpop.permute.xlu0 %178 }
 0x103   : > { %v181_v16 = vsel %vm180_vm3, %v177_v14, %v179_v15 }
 0x104   : > { %427 = vmatprep.subr.mxu0 %v181_v16  ;;  %438 = vmatprep.subr.mxu1 %v181_v16 }
 0x105   : > { %428 = vmatpush3.msra.mxu0 %v181_v16  ;;  %441 = vmatpush3.msra.mxu1 %v181_v16 }
 0x106   : > { %429 = vmatprep.subr.msk.mxu0 %vm406_vm4, %v169_v4  ;;  %439 = vmatprep.subr.msk.mxu1 %vm406_vm4, %v169_v4 }
 0x107   : > { %430 = vmatpush3.msk.msra.mxu0 %vm406_vm4, %v169_v4  ;;  %442 = vmatpush3.msk.msra.mxu1 %vm406_vm4, %v169_v4 }
 0x108   : > { %432 = vmatmul.mubr.msk.f32.vlgmr.msra.gmra.mxu0 %vm218_vm0, %v191_v17  ;;  %435 = vmatmul.mubr.msk.f32.vlgmr.msra.gmra.mxu1 %vm218_vm0, %v193_v18 }
 0x10f   : > { %v201_v19 = vpop.permute.xlu1 %200  ;;  %v206_v21 = vpop.permute.xlu0 %205 }
 0x113   : > { %v211_v20 = vpop.permute.xlu1 %210 }
 0x117   : > { %v216_v22 = vpop.permute.xlu1 %215 }
 0x1c8   : > { %v433_v23 = vpop.f32.mrf.mxu0  ;;  %v436_v24 = vpop.f32.mrf.mxu1 }
 0x1c9   : > { %v313_v25 = vadd.f32 %v436_v24, %v216_v22  ;;  %v303_v26 = vadd.f32 %v433_v23, %v206_v21 }
 0x1ca   : > { %v297_v27 = vpop.f32.mrf.mxu0  ;;  %v307_v28 = vpop.f32.mrf.mxu1 }
 0x1cb   : > { %v319_v29 = vmax.f32 %v313_v25, 0.0  ;;  %v317_v30 = vmax.f32 %v303_v26, 0.0  ;;  %v298_v31 = vadd.f32 %v297_v27, %v201_v19  ;;  %v308_v32 = vadd.f32 %v307_v28, %v211_v20 }
 0x1cd   : > { %323 = vst [vmem:[%s161_s5 + $0x18] sm:$0xff] %v319_v29  ;;  %321 = vst [vmem:[%s161_s5 + $0x8] sm:$0xff] %v317_v30  ;;  %v316_v33 = vmax.f32 %v298_v31, 0.0  ;;  %v318_v34 = vmax.f32 %v308_v32, 0.0 }
 0x1cf   : > { %320 = vst [vmem:[%s161_s5] sm:$0xff] %v316_v33  ;;  %322 = vst [vmem:[%s161_s5 + $0x10] sm:$0xff] %v318_v34 }
 0x1d0   : > { %503 = shalt.err (!%p500_p3)
}
 0x1d1   : > { %s504_s24 = scalar_lea.hbm %s670_s10, 512  ;;  %s508_s27 = scalar_lea.hbm %s715_s3, 1024 }
 0x1d2   : > { %p505_p4 = scmp.ne.s32.totalorder %s670_s10, %s504_s24  ;;  %p509_p9 = scmp.lt.s32.totalorder %s670_s10, %s715_s3 }
 0x1d3   : > { %p510_p10 = scmp.lt.s32.totalorder %s508_s27, %s504_s24 }
 0x1d4   : > { %p506_p7 = pnand %p505_p4, %p617_p5 }
 0x1d5   : > { %p511_p11 = por %p510_p10, %p509_p9 }
 0x1d6   : > { %p507_p8 = pneg %p506_p7 }
 0x1d8   : > { %p512_p12 = pnand %p511_p11, %p507_p8 }
 0x1da   : > { %515 = shalt.err (!%p512_p12)
}
 0x1db   : > { %s557_s30 = smov 128   ;;  %s558_s4 = smov 8  }
 0x1dc   : > { %443 = dma.vmem_to_hbm [thread:$0]  (%p617_p5), %s665_s6, 512, %s670_s10, %s672_s16, %s557_s30, %s557_s30, %s558_s4  }
 0x1dd PF: > { %p449_p13 = scmp.ge.s32.totalorder %s550_s15, 2  ;;  %s353_s5 = sand.u32 1, %s538_s12  }
 0x1de   : > { %s354_s7 = scalar_lea.sflag [#allocation3], %s353_s5 }
 0x1df   : > { %p446_p0 = pnand %p449_p13, %p621_p6 }
 0x1e1   : > { %p447_p1 = pneg %p446_p0 }
 0x1e3   : > { %533 = dma.done.wait (%p447_p1), %s354_s7, 512  }
 0x1e4   : > { %535 = vsyncadd (%p447_p1), %s354_s7, 4294966784  ;;  %p13_p2 = scmp.ge.s32.totalorder %s604_s18, 4   ;;  %s718_s12 = smov %s542_s13 }
 0x1e5   : > { %s719_s13 = smov %s546_s14  ;;  %s720_s14 = smov %s615_s21 }
 0x1e6   : > { %s721_s15 = smov %s604_s18  ;;  %15 = sbr.rel (!%p13_p2) target bundleno = 3 (0x3), region = 67 }
 0x1eb   :  { %359 = vsyncpa [#allocation3], 1 }
 0x1ec   :  { %361 = vsyncpa [#allocation3 + $0x1], 1 }

</bundles_post_ra>
